<compile_context>
chip_gen: v6e
topology: v6e:2x2x1
jax: 0.10.0
libtpu: 0.0.40
codegen_flags: <defaults>
</compile_context>

<pallas_src>
import functools

import jax
import jax.numpy as jnp
from jax import lax
from jax.experimental import pallas as pl
from jax.experimental.pallas import tpu as pltpu


def make_positional_encoding(max_len: int, d_model: int, dtype=jnp.float32):
    """Standard sinusoidal PE table of shape (max_len, d_model)."""
    pos = jnp.arange(max_len, dtype=jnp.float32)[:, None]          # (L, 1)
    idx = jnp.arange(0, d_model, 2, dtype=jnp.float32)[None, :]    # (1, D/2)
    angle = pos / jnp.power(10000.0, idx / float(d_model))         # (L, D/2)
    pe = jnp.zeros((max_len, d_model), dtype=jnp.float32)
    pe = pe.at[:, 0::2].set(jnp.sin(angle))
    pe = pe.at[:, 1::2].set(jnp.cos(angle))
    return pe.astype(dtype)


def _embedding_kernel(ids_smem, pe_ref, emb_hbm, *args,
                      rows_per_tile: int, seq_len: int, seqs_per_tile: int,
                      dropout_prob: float, apply_dropout: bool):
    """One grid step = rows_per_tile consecutive tokens (whole sequences).

    ids_smem : (N_pad,) int32 token ids, scalar-prefetched into SMEM.
    pe_ref   : (max_len, D) VMEM-resident positional-encoding table.
    emb_hbm  : (V, D) embedding table left in HBM (manual DMA gather).
    args     : [u_ref,] out_ref, emb_buf (VMEM scratch), gather_sem (DMA sem).
    """
    if apply_dropout:
        u_ref, out_ref, emb_buf, gather_sem = args
    else:
        out_ref, emb_buf, gather_sem = args
        u_ref = None

    base = pl.program_id(0) * rows_per_tile

    # ---- Batched embedding-row gather: issue all T row DMAs, then wait. ----
    def _row_copy(r):
        row = ids_smem[base + r]
        return pltpu.make_async_copy(
            emb_hbm.at[pl.ds(row, 1), :],      # (1, D) row in HBM
            emb_buf.at[pl.ds(r, 1), :],        # (1, D) slot in VMEM scratch
            gather_sem)

    def _issue(r, carry):
        _row_copy(r).start()
        return carry
    lax.fori_loop(0, rows_per_tile, _issue, 0)

    def _wait(r, carry):
        _row_copy(r).wait()
        return carry
    lax.fori_loop(0, rows_per_tile, _wait, 0)

    tok = emb_buf[...].astype(jnp.float32)                      # (T, D)

    # ---- Positional encoding for the tile (tile covers whole sequences). ----
    pe_seq = pe_ref[pl.ds(0, seq_len), :].astype(jnp.float32)    # (S, D)
    if seqs_per_tile > 1:
        pe_tile = jnp.concatenate([pe_seq] * seqs_per_tile, axis=0)  # (T, D)
    else:
        pe_tile = pe_seq

    val = tok + pe_tile

    # ---- Inverted dropout (mask generated outside; applied in-kernel). ----
    if apply_dropout:
        keep = u_ref[...] >= jnp.float32(dropout_prob)
        scale = jnp.float32(1.0 / (1.0 - dropout_prob))
        val = jnp.where(keep, val * scale, jnp.zeros_like(val))

    out_ref[...] = val.astype(out_ref.dtype)


def _choose_seqs_per_tile(batch: int, seq_len: int, target_rows: int = 128):
    """Pick how many sequences go into one tile so that T = k*S is a multiple
    of 8 (dense sublanes) and roughly <= target_rows, without exceeding the
    (padded) batch."""
    k0 = 1
    while (k0 * seq_len) % 8 != 0:
        k0 += 1                     # k0 <= 8
    b_ceil = -(-batch // k0) * k0   # batch rounded up to a multiple of k0
    k = k0
    while (k + k0) * seq_len <= target_rows and (k + k0) <= b_ceil:
        k += k0
    return k


def transformer_embedding(token_ids, emb_table, pe_table, *,
                          dropout_prob: float = 0.0,
                          training: bool = False,
                          rng_key=None):
    """token_ids: (B, S) int32 -> (B, S, D)."""
    B, S = token_ids.shape
    V, D = emb_table.shape
    L = pe_table.shape[0]
    if S > L:
        raise ValueError(f"sequence length {S} exceeds max_len {L}")

    # Tile geometry: T tokens (= seqs_per_tile whole sequences) per grid step.
    # TODO(synk): very long sequences would need intra-sequence tiling of T.
    k = _choose_seqs_per_tile(B, S)
    T = k * S
    B_pad = -(-B // k) * k
    if B_pad != B:
        token_ids = jnp.pad(token_ids, ((0, B_pad - B), (0, 0)))
    N_pad = B_pad * S
    num_tiles = N_pad // T

    flat_ids = token_ids.reshape(-1).astype(jnp.int32)

    apply_dropout = bool(training) and float(dropout_prob) > 0.0

    inputs = [flat_ids, pe_table, emb_table]
    in_specs = [
        # PE table: full array, constant block index -> loaded into VMEM once.
        pl.BlockSpec((L, D), lambda i, ids: (0, 0)),
        # Embedding table stays in HBM; rows are gathered with manual DMAs.
        pl.BlockSpec(memory_space=pl.ANY),
    ]
    if apply_dropout:
        # pltpu.prng_* has no lowering on the interpret platform, so the
        # uniforms are drawn here and only the mask/scale runs in-kernel.
        key = jax.random.PRNGKey(0) if rng_key is None else rng_key
        u = jax.random.uniform(key, (N_pad, D), dtype=jnp.float32)
        inputs.append(u)
        in_specs.append(pl.BlockSpec((T, D), lambda i, ids: (i, 0)))

    kernel = functools.partial(
        _embedding_kernel,
        rows_per_tile=T, seq_len=S, seqs_per_tile=k,
        dropout_prob=float(dropout_prob), apply_dropout=apply_dropout)

    grid_spec = pltpu.PrefetchScalarGridSpec(
        num_scalar_prefetch=1,          # flat token ids land in SMEM
        grid=(num_tiles,),
        in_specs=in_specs,
        out_specs=pl.BlockSpec((T, D), lambda i, ids: (i, 0)),
        scratch_shapes=[
            pltpu.VMEM((T, D), emb_table.dtype),   # gathered embedding rows
            pltpu.SemaphoreType.DMA,               # shared gather semaphore
        ],
    )

    out_flat = pl.pallas_call(
        kernel,
        out_shape=jax.ShapeDtypeStruct((N_pad, D), emb_table.dtype),
        grid_spec=grid_spec,
        compiler_params=pltpu.CompilerParams(
            dimension_semantics=("parallel",)),   # tiles are independent
    )(*inputs)

    out = out_flat.reshape(B_pad, S, D)
    return out[:B] if B_pad != B else out


if __name__ == "__main__":
    # Small shapes consistent with the module's forward.
    vocab_size = 32
    d_model = 128
    max_len = 16
    batch = 2
    seq = 8
    dropout_prob = 0.1
    padding_index = 0  # nn.Embedding(padding_idx=0): that row is zero.

    key = jax.random.PRNGKey(0)
    k_emb, k_ids, k_drop = jax.random.split(key, 3)

    # Deterministic synthetic parameters (no checkpoint).
    emb_table = 0.02 * jax.random.normal(k_emb, (vocab_size, d_model),
                                         dtype=jnp.float32)
    emb_table = emb_table.at[padding_index].set(0.0)   # padding_idx row = 0
    pe_table = make_positional_encoding(max_len, d_model, dtype=jnp.float32)

    token_ids = jax.random.randint(k_ids, (batch, seq), 0, vocab_size,
                                   dtype=jnp.int32)

    # Eval-mode forward (dropout is identity) — check against pure-JAX ref.
    out_eval = transformer_embedding(token_ids, emb_table, pe_table,
                                     dropout_prob=dropout_prob,
                                     training=False)
    out_eval = jax.block_until_ready(out_eval)

    ref = emb_table[token_ids] + pe_table[:seq][None, :, :]
    assert out_eval.shape == (batch, seq, d_model)
    assert jnp.allclose(out_eval, ref, atol=1e-5), "eval mismatch vs reference"

    # Training-mode forward (inverted dropout applied inside the kernel).
    out_train = transformer_embedding(token_ids, emb_table, pe_table,
                                      dropout_prob=dropout_prob,
                                      training=True, rng_key=k_drop)
    out_train = jax.block_until_ready(out_train)
    assert out_train.shape == (batch, seq, d_model)
    # Every element is either dropped (exactly 0) or kept and scaled by 1/(1-p).
    scaled_ref = ref / (1.0 - dropout_prob)
    consistent = jnp.all((out_train == 0.0)
                         | (jnp.abs(out_train - scaled_ref) < 1e-4))
    assert bool(consistent), "training-mode dropout output inconsistent"

    print("KERNEL_OK")
</pallas_src>

<mosaic_0001>
module attributes {stable_mosaic.version = 11 : i64} {
  func.func @_embedding_kernel(%arg0: i32, %arg1: memref<16xi32, #tpu.memory_space<smem>>, %arg2: memref<16x128xf32, #tpu.memory_space<vmem>>, %arg3: memref<32x128xf32, #tpu.memory_space<any>>, %arg4: memref<16x128xf32, #tpu.memory_space<vmem>>, %arg5: memref<16x128xf32, #tpu.memory_space<vmem>>, %arg6: memref<!tpu.dma_semaphore, #tpu.memory_space<semaphore_mem>>) attributes {dimension_semantics = [#tpu.dimension_semantics<parallel>], iteration_bounds = array<i64: 1>, scalar_prefetch = 1 : i64, scratch_operands = 2 : i64, tpu.core_type = #tpu.core_type<tc>, window_params = [{pipeline_mode = #tpu.pipeline_mode<synchronous>, transform_indices = @transform_0, window_bounds = array<i64: 16, 128>}, {}, {transform_indices = @transform_2, window_bounds = array<i64: 16, 128>}]} {
    %c16_i32 = arith.constant 16 : i32
    %0 = arith.muli %arg0, %c16_i32 : i32
    %c0_i32 = arith.constant 0 : i32
    %c16_i32_0 = arith.constant 16 : i32
    %1 = arith.addi %c0_i32, %c16_i32_0 : i32
    %c1_i32 = arith.constant 1 : i32
    scf.for %arg7 = %c0_i32 to %1 step %c1_i32  : i32 {
      %8 = arith.addi %0, %arg7 : i32
      %9 = arith.index_cast %8 : i32 to index
      %10 = memref.load %arg1[%9] : memref<16xi32, #tpu.memory_space<smem>>
      %c0_i32_11 = arith.constant 0 : i32
      %11 = tpu.memref_slice %arg3[%10, %c0_i32_11] : memref<32x128xf32, #tpu.memory_space<any>> -> memref<1x128xf32, #tpu.memory_space<any>>
      %c0_i32_12 = arith.constant 0 : i32
      %12 = tpu.memref_slice %arg5[%arg7, %c0_i32_12] : memref<16x128xf32, #tpu.memory_space<vmem>> -> memref<1x128xf32, #tpu.memory_space<vmem>>
      tpu.enqueue_dma source(%11 : memref<1x128xf32, #tpu.memory_space<any>>) target(%12 : memref<1x128xf32, #tpu.memory_space<vmem>>) target_semaphore(%arg6 : memref<!tpu.dma_semaphore, #tpu.memory_space<semaphore_mem>>)
    }
    %c16_i32_1 = arith.constant 16 : i32
    %c0_i32_2 = arith.constant 0 : i32
    %c16_i32_3 = arith.constant 16 : i32
    %2 = arith.addi %c0_i32_2, %c16_i32_3 : i32
    %c1_i32_4 = arith.constant 1 : i32
    scf.for %arg7 = %c0_i32_2 to %2 step %c1_i32_4  : i32 {
      %8 = arith.addi %0, %arg7 : i32
      %9 = arith.index_cast %8 : i32 to index
      %10 = memref.load %arg1[%9] : memref<16xi32, #tpu.memory_space<smem>>
      %c0_i32_11 = arith.constant 0 : i32
      %11 = tpu.memref_slice %arg3[%10, %c0_i32_11] : memref<32x128xf32, #tpu.memory_space<any>> -> memref<1x128xf32, #tpu.memory_space<any>>
      %c0_i32_12 = arith.constant 0 : i32
      %12 = tpu.memref_slice %arg5[%arg7, %c0_i32_12] : memref<16x128xf32, #tpu.memory_space<vmem>> -> memref<1x128xf32, #tpu.memory_space<vmem>>
      tpu.wait_dma2 semaphore(%arg6 : memref<!tpu.dma_semaphore, #tpu.memory_space<semaphore_mem>>) src(%11 : memref<1x128xf32, #tpu.memory_space<any>>) dst(%12 : memref<1x128xf32, #tpu.memory_space<vmem>>)
    }
    %c16_i32_5 = arith.constant 16 : i32
    %c0 = arith.constant 0 : index
    %c0_6 = arith.constant 0 : index
    %3 = vector.load %arg5[%c0, %c0_6] : memref<16x128xf32, #tpu.memory_space<vmem>>, vector<16x128xf32>
    %c0_7 = arith.constant 0 : index
    %c0_8 = arith.constant 0 : index
    %4 = vector.load %arg2[%c0_7, %c0_8] : memref<16x128xf32, #tpu.memory_space<vmem>>, vector<8x128xf32>
    %5 = tpu.concatenate %4, %4 in 0 : vector<8x128xf32>, vector<8x128xf32> -> vector<16x128xf32>
    %6 = arith.addf %3, %5 : vector<16x128xf32>
    %c0_9 = arith.constant 0 : index
    %c0_10 = arith.constant 0 : index
    %7 = vector.load %arg4[%c0_9, %c0_10] : memref<16x128xf32, #tpu.memory_space<vmem>>, vector<16x128xf32>
    tpu.vector_store %arg4[%c0_9, %c0_10], %6 {strides = array<i32>} : memref<16x128xf32, #tpu.memory_space<vmem>>, vector<16x128xf32>,
    return
  }
  func.func @transform_0(%arg0: i32, %arg1: memref<16xi32, #tpu.memory_space<smem>>) -> (i32, i32) {
    %c0_i32 = arith.constant 0 : i32
    %c0_i32_0 = arith.constant 0 : i32
    %c0_i32_1 = arith.constant 0 : i32
    return %c0_i32, %c0_i32_0 : i32, i32
  }
  func.func @transform_2(%arg0: i32, %arg1: memref<16xi32, #tpu.memory_space<smem>>) -> (i32, i32) {
    %c0_i32 = arith.constant 0 : i32
    %c0_i32_0 = arith.constant 0 : i32
    return %arg0, %c0_i32 : i32, i32
  }
}

</mosaic_0001>

<bundles_post_ra>
// kernel: tpu_custom_call.1
= control target key start
LH: loop header
LB: loop body
LE: loop exit
PB: predicated region body
PF: predicated region fallthrough
CT: control target
= control target key end

     0   :  { %s223_s12 = smov [#allocation5]   ;;  %s283_s0 = inlined_call_operand.hbm [shape: s32[16], index: 0, kind: input, shape index: {}]   ;;  %s284_s1 = inlined_call_operand.hbm [shape: f32[16,128], index: 1, kind: input, shape index: {}]   ;;  %s285_s2 = inlined_call_operand.hbm [shape: f32[32,128], index: 2, kind: input, shape index: {}]   ;;  %s286_s3 = inlined_call_operand.hbm [shape: f32[16,128], index: 3, kind: output, shape index: {}]  }
   0x1   :  { %9 = dma.hbm_to_smem %s283_s0, 16, %s223_s12, [#allocation4] }
   0x2   :  { %207 = dma.done.wait [#allocation4], 16 }
   0x3   :  { %208 = vsyncadd [#allocation4], 4294967280 }
   0x4   :  { %11 = sfence }
   0x5   :  { %12 = vsyncpa [#allocation7], 0 }
   0x6   :  { %13 = vsyncpa [#allocation8], 0  ;;  %s224_s15 = smov [#allocation6]  }
   0x7   :  { %s19_s16 = sshll.u32 %s224_s15, 4  ;;  %s20_s16 = int_to_ptr.vmem [resolvable:$true] %s19_s16 }
   0x8   :  { %s145_s17 = scalar_lea.vmem %s20_s16, 256  ;;  %p150_p1 = scmp.lt.s32.totalorder %s20_s16, %s20_s16 }
   0x9   :  { %p146_p0 = scmp.ne.s32.totalorder %s20_s16, %s145_s17  ;;  %p151_p2 = scmp.lt.s32.totalorder %s145_s17, %s145_s17 }
   0xb   :  { %p152_p3 = por %p151_p2, %p150_p1 }
   0xd   :  { %p153_p4 = pnand %p152_p3, %p146_p0 }
   0xf   :  { %156 = shalt.err (!%p153_p4)
}
  0x10   :  { %s225_s18 = smov 128   ;;  %s226_s19 = smov 8  }
  0x11   :  { %25 = dma.hbm_to_vmem [thread:$0]  %s284_s1, 256, %s20_s16, [#allocation7], %s225_s18, %s225_s18, %s226_s19  }
  0x12   :  { %209 = dma.done.wait [#allocation7], 256  }
  0x13   :  { %210 = vsyncadd [#allocation7], 4294967040  ;;  %s258_s21 = smov 0  }
  0x14 LB: > { %s37_s22 = sld [smem:[#allocation5 + %s217_s21]]  ;;  %s40_s23 = scalar_lea.vmem [#allocation2], %s217_s21  ;;  %s217_s21 = sphi %s258_s21, %s35_s21  }
  0x15   : > { %s48_s24 = sshll.u32 %s40_s23, 4  ;;  %s159_s4 = scalar_lea.hbm %s285_s2, 512  ;;  %s49_s24 = int_to_ptr.vmem [resolvable:$true] %s48_s24 }
  0x1a   : > { %s106_s25 = sshll.u32 %s37_s22, 4 }
  0x1b   : > { %s39_s1 = scalar_lea.hbm %s285_s2, %s106_s25 }
  0x1c   : > { %s157_s28 = scalar_lea.hbm %s39_s1, 16  ;;  %p160_p6 = scmp.lt.s32.totalorder %s39_s1, %s285_s2 }
  0x1d   : > { %p158_p5 = scmp.ne.s32.totalorder %s39_s1, %s157_s28  ;;  %p161_p7 = scmp.lt.s32.totalorder %s159_s4, %s157_s28 }
  0x1f   : > { %p162_p8 = por %p161_p7, %p160_p6 }
  0x21   : > { %p163_p9 = pnand %p162_p8, %p158_p5 }
  0x23   : > { %166 = shalt.err (!%p163_p9)  }
  0x24   : > { %s167_s7 = scalar_lea.vmem %s49_s24, 16  ;;  %s227_s8 = smov [#allocation2]  }
  0x25   : > { %p168_p10 = scmp.ne.s32.totalorder %s49_s24, %s167_s7  ;;  %s169_s9 = sshll.u32 %s227_s8, 4  ;;  %s170_s9 = int_to_ptr.vmem [resolvable:$false] %s169_s9 }
  0x26   : > { %s171_s10 = scalar_lea.vmem %s170_s9, 256  ;;  %p172_p11 = scmp.lt.s32.totalorder %s49_s24, %s170_s9 }
  0x27   : > { %p173_p12 = scmp.lt.s32.totalorder %s171_s10, %s167_s7 }
  0x29   : > { %p174_p13 = por %p173_p12, %p172_p11 }
  0x2b   : > { %p175_p0 = pnand %p174_p13, %p168_p10 }
  0x2d   : > { %178 = shalt.err (!%p175_p0)  }
  0x2e   : > { %51 = dma.hbm_to_vmem [thread:$0]  %s39_s1, 16, %s49_s24, [#allocation3] }
  0x2f   : > { %s35_s21 = sadd.s32 1, %s217_s21  }
  0x30   : > { %p32_p1 = scmp.ge.s32.totalorder %s35_s21, 16  }
  0x31   :  { %s219_s11 = smov (%p32_p1), 0  }
  0x32   :  { %34 = sbr.rel (!%p32_p1) target bundleno = 20 (0x14), region = 48 }
  0x37 LB: > { %211 = dma.done.wait [#allocation3], 16  ;;  %s221_s11 = sphi %s219_s11, %s57_s11  }
  0x38   : > { %212 = vsyncadd [#allocation3], 4294967280  ;;  %s57_s11 = sadd.s32 1, %s221_s11  }
  0x39   : > { %p54_p2 = scmp.ge.s32.totalorder %s57_s11, 16  }
  0x3a   :  { %v63_v0 = vld [vmem:[#allocation2] sm:$0xff] (%p54_p2)  ;;  %v65_v1 = vld [vmem:[#allocation6] sm:$0xff] (%p54_p2)  ;;  %v64_v2 = vld [vmem:[#allocation2 + $0x8] sm:$0xff] (%p54_p2)  ;;  %s228_s12 = smov (%p54_p2), [#allocation9]  }
  0x3b   :  { %56 = sbr.rel (!%p54_p2) target bundleno = 55 (0x37), region = 59  ;;  %v66_v3 = vadd.f32 (%p54_p2), %v65_v1, %v63_v0  ;;  %v67_v4 = vadd.f32 (%p54_p2), %v65_v1, %v64_v2  ;;  %s75_s13 = sshll.u32 (%p54_p2), %s228_s12, 4  ;;  %s76_s13 = int_to_ptr.vmem [resolvable:$true] %s75_s13 }
  0x3c   :  { %s179_s2 = scalar_lea.vmem (%p54_p2), %s76_s13, 256  ;;  %p184_p4 = scmp.lt.s32.totalorder (%p54_p2), %s76_s13, %s76_s13 }
  0x3d   :  { %68 = vst [vmem:[#allocation9] sm:$0xff] (%p54_p2), %v66_v3  ;;  %69 = vst [vmem:[#allocation9 + $0x8] sm:$0xff] (%p54_p2), %v67_v4  ;;  %p180_p3 = scmp.ne.s32.totalorder (%p54_p2), %s76_s13, %s179_s2  ;;  %p185_p5 = scmp.lt.s32.totalorder (%p54_p2), %s179_s2, %s179_s2 }
  0x3f   :  { %p186_p6 = por (%p54_p2), %p185_p5, %p184_p4 }
  0x41   :  { %p187_p7 = pnand %p186_p6, %p180_p3 }
  0x43   :  { %190 = shalt.err (!%p187_p7)
}
  0x44   :  { %81 = dma.vmem_to_hbm [thread:$0]  %s76_s13, 256, %s286_s3, [#allocation8], %s225_s18, %s225_s18, %s226_s19  }
  0x45   :  { %213 = dma.done.wait [#allocation8], 256  }
  0x46   :  { %214 = vsyncadd [#allocation8], 4294967040 }
  0x47   :  { %85 = vsyncpa [#allocation7], 1 }
  0x48   :  { %86 = vsyncpa [#allocation8], 1 }
  0x49   :  { %87 = vsyncmov [#allocation3] }
  0x4c   :  { %s88_s16 = vpop.sfrf %87 }
  0x4d   :  { %p107_p8 = scmp.ne.s32.totalorder %s88_s16, 0 }
  0x4f   :  { %92 = shalt.err (%p107_p8)  }

</bundles_post_ra>
